<compile_context>
chip_gen: v7x
topology: tpu7x:2x2x1
jax: 0.10.0
libtpu: 0.0.40
codegen_flags: <defaults>
</compile_context>

<pallas_src>
import math
from functools import partial

import jax
import jax.numpy as jnp
from jax.experimental import pallas as pl
from jax.experimental.pallas import tpu as pltpu


def _round_up(x, m):
    return (x + m - 1) // m * m


def _fused_mlp_kernel(mxu_dtype, x_ref, *refs):
    """refs = (w0, b0, w1, b1, ..., o_ref). One row tile through every layer."""
    o_ref = refs[-1]
    wb = refs[:-1]
    num_layers = len(wb) // 2

    h = x_ref[...].astype(jnp.float32)                 # (tm, D0)
    for li in range(num_layers):                       # static unroll
        w_ref = wb[2 * li]                             # (Din_k, Dout_k), VMEM-resident
        b_ref = wb[2 * li + 1]                         # (1, Dout_k), f32
        # MXU in bf16 (or f32), accumulate f32.
        h = jnp.dot(h.astype(mxu_dtype), w_ref[...],
                    preferred_element_type=jnp.float32)
        # Bias-add + ReLU stay f32 on the VPU.
        h = jnp.maximum(h + b_ref[...].astype(jnp.float32), 0.0)
    o_ref[...] = h.astype(o_ref.dtype)


def nerv_mlp(x, params, *, tm=1024, mxu_dtype=jnp.bfloat16,
             single_buffer_weights=True):
    """NeRVMLP forward: ReLU(x @ W_i + b_i) for every layer, fused in one kernel.

    x:      (N, D0)
    params: list of (W_i, b_i) with W_i (D_i, D_{i+1}), b_i (1, D_{i+1}).
    """
    assert len(params) >= 1
    N, d0 = x.shape
    L = len(params)
    dims = [d0] + [w.shape[1] for w, _ in params]

    # Kernel-side feature widths: true width for the HBM-streamed input/output,
    # 128-lane padded for the on-chip hidden activations / weight interiors.
    kdims = list(dims)
    for i in range(1, L):
        kdims[i] = _round_up(dims[i], 128)

    itemsize = jnp.dtype(x.dtype).itemsize
    w_itemsize = jnp.dtype(mxu_dtype).itemsize

    # ---- row tiling --------------------------------------------------------
    n8 = _round_up(N, 8)
    tm_eff = min(tm, n8)
    if n8 >= 512:
        # Guarantee >= 2 grid steps so both v7x TensorCores get work under
        # dimension_semantics=("parallel",).
        tm_eff = min(tm_eff, max(256, _round_up(pl.cdiv(n8, 2), 256)))
    n_pad = _round_up(N, tm_eff)
    grid = (n_pad // tm_eff,)

    # ---- pad & cast weights / biases ----------------------------------------
    flat_wb = []
    wb_bytes = 0
    for i, (w, b) in enumerate(params):
        din, dout = dims[i], dims[i + 1]
        din_k, dout_k = kdims[i], kdims[i + 1]
        w_p = jnp.zeros((din_k, dout_k), mxu_dtype).at[:din, :dout].set(
            w.astype(mxu_dtype))
        b_p = jnp.zeros((1, dout_k), jnp.float32).at[:, :dout].set(
            b.reshape(1, dout).astype(jnp.float32))
        flat_wb += [w_p, b_p]
        wb_bytes += w_p.size * w_itemsize + b_p.size * 4

    # ---- row-pad the streamed input (zero rows; stripped on return) ---------
    x_p = x
    if n_pad != N:
        x_p = jnp.zeros((n_pad, d0), x.dtype).at[:N, :].set(x)

    # ---- block specs ---------------------------------------------------------
    in_specs = [pl.BlockSpec((tm_eff, d0), lambda i: (i, 0))]   # streamed x tile
    for i in range(L):
        din_k, dout_k = kdims[i], kdims[i + 1]
        if single_buffer_weights:
            # Grid-invariant blocks: DMA'd once, single-buffered (no 2x VMEM).
            in_specs.append(pl.BlockSpec((din_k, dout_k), lambda i: (0, 0),
                                         pipeline_mode=pl.Buffered(1)))
            in_specs.append(pl.BlockSpec((1, dout_k), lambda i: (0, 0),
                                         pipeline_mode=pl.Buffered(1)))
        else:
            in_specs.append(pl.BlockSpec((din_k, dout_k), lambda i: (0, 0)))
            in_specs.append(pl.BlockSpec((1, dout_k), lambda i: (0, 0)))
    out_spec = pl.BlockSpec((tm_eff, dims[-1]), lambda i: (i, 0))

    # ---- explicit VMEM budget ------------------------------------------------
    buf = 1 if single_buffer_weights else 2
    io_bytes = 2 * tm_eff * (d0 + dims[-1]) * itemsize     # double-buffered x/out
    act_bytes = 2 * tm_eff * max(kdims) * 4                # live f32 activations
    budget = int(1.25 * (buf * wb_bytes + io_bytes + act_bytes))
    try:
        vmem_cap = pltpu.get_tpu_info().vmem_capacity_bytes
    except Exception:
        vmem_cap = 64 << 20                                # v7x per-TC floor
    vmem_limit = min(max(budget, 16 << 20), int(vmem_cap * 0.9))

    # ---- cost estimate -------------------------------------------------------
    flops = 2 * N * sum(dims[i] * dims[i + 1] for i in range(L))
    bytes_accessed = N * (d0 + dims[-1]) * itemsize + wb_bytes
    cost = pl.CostEstimate(flops=flops, transcendentals=0,
                           bytes_accessed=bytes_accessed)

    out_p = pl.pallas_call(
        partial(_fused_mlp_kernel, mxu_dtype),
        out_shape=jax.ShapeDtypeStruct((n_pad, dims[-1]), x.dtype),
        grid_spec=pltpu.PrefetchScalarGridSpec(
            num_scalar_prefetch=0,
            grid=grid,
            in_specs=in_specs,
            out_specs=out_spec,
        ),
        compiler_params=pltpu.CompilerParams(
            dimension_semantics=("parallel",),
            vmem_limit_bytes=vmem_limit,
        ),
        cost_estimate=cost,
    )(x_p, *flat_wb)

    return out_p[:N] if n_pad != N else out_p


def init_nerv_mlp_params(key, dim_list):
    """Deterministic init matching nn.Linear default: U(-1/sqrt(fan_in), +)."""
    params = []
    for i in range(len(dim_list) - 1):
        din, dout = dim_list[i], dim_list[i + 1]
        key, kw, kb = jax.random.split(key, 3)
        bound = 1.0 / math.sqrt(din)
        w = jax.random.uniform(kw, (din, dout), jnp.float32, -bound, bound)
        b = jax.random.uniform(kb, (1, dout), jnp.float32, -bound, bound)
        params.append((w, b))
    return params


def nerv_mlp_reference(x, params, mxu_dtype=None):
    """Pure-JAX reference.  mxu_dtype mirrors the kernel's MXU input dtype."""
    h = x.astype(jnp.float32)
    for w, b in params:
        if mxu_dtype is not None:
            y = jnp.dot(h.astype(mxu_dtype), w.astype(mxu_dtype),
                        preferred_element_type=jnp.float32)
        else:
            y = jnp.dot(h, w, preferred_element_type=jnp.float32,
                        precision=jax.lax.Precision.HIGHEST)
        h = jnp.maximum(y + b.reshape(1, -1).astype(jnp.float32), 0.0)
    return h


if __name__ == "__main__":
    key = jax.random.PRNGKey(0)
    dim_list = [16, 32, 64, 8]     # NeRVMLP(dim_list=[16, 32, 64, 8], act='relu')
    N = 37                         # number of input points (exercises row padding)

    kx, kp = jax.random.split(key)
    x = jax.random.normal(kx, (N, dim_list[0]), jnp.float32)
    params = init_nerv_mlp_params(kp, dim_list)

    def run(single_buffer):
        fwd = jax.jit(partial(nerv_mlp, tm=1024, mxu_dtype=jnp.bfloat16,
                              single_buffer_weights=single_buffer))
        return jax.block_until_ready(fwd(x, params))

    try:
        out = run(True)
    except Exception:
        # Fallback if this JAX build rejects single-buffered (Buffered(1)) specs.
        out = run(False)

    assert out.shape == (N, dim_list[-1])

    # Tight check against a reference that mirrors the kernel's bf16-MXU numerics,
    # plus a loose check against the full-f32 reference.
    ref_bf16 = nerv_mlp_reference(x, params, mxu_dtype=jnp.bfloat16)
    ref_f32 = nerv_mlp_reference(x, params)
    assert jnp.allclose(out, ref_bf16, atol=1e-3, rtol=1e-3)
    assert jnp.allclose(out, ref_f32, atol=5e-2, rtol=5e-2)

    print("KERNEL_OK")
</pallas_src>

<mosaic_0001>
module attributes {stable_mosaic.version = 11 : i64} {
  func.func @_fused_mlp_kernel(%arg0: i32, %arg1: memref<40x16xf32, #tpu.memory_space<vmem>>, %arg2: memref<16x128xbf16, #tpu.memory_space<vmem>>, %arg3: memref<1x128xf32, #tpu.memory_space<vmem>>, %arg4: memref<128x128xbf16, #tpu.memory_space<vmem>>, %arg5: memref<1x128xf32, #tpu.memory_space<vmem>>, %arg6: memref<128x8xbf16, #tpu.memory_space<vmem>>, %arg7: memref<1x8xf32, #tpu.memory_space<vmem>>, %arg8: memref<40x8xf32, #tpu.memory_space<vmem>>) attributes {dimension_semantics = [#tpu.dimension_semantics<parallel>], iteration_bounds = array<i64: 1>, scalar_prefetch = 0 : i64, scratch_operands = 0 : i64, tpu.core_type = #tpu.core_type<tc>, window_params = [{transform_indices = @transform_0, window_bounds = array<i64: 40, 16>}, {pipeline_mode = #tpu.pipeline_mode<synchronous>, transform_indices = @transform_1, window_bounds = array<i64: 16, 128>}, {pipeline_mode = #tpu.pipeline_mode<synchronous>, transform_indices = @transform_2, window_bounds = array<i64: 1, 128>}, {pipeline_mode = #tpu.pipeline_mode<synchronous>, transform_indices = @transform_3, window_bounds = array<i64: 128, 128>}, {pipeline_mode = #tpu.pipeline_mode<synchronous>, transform_indices = @transform_4, window_bounds = array<i64: 1, 128>}, {pipeline_mode = #tpu.pipeline_mode<synchronous>, transform_indices = @transform_5, window_bounds = array<i64: 128, 8>}, {pipeline_mode = #tpu.pipeline_mode<synchronous>, transform_indices = @transform_6, window_bounds = array<i64: 1, 8>}, {transform_indices = @transform_7, window_bounds = array<i64: 40, 8>}]} {
    %c0 = arith.constant 0 : index
    %c0_0 = arith.constant 0 : index
    %0 = vector.load %arg1[%c0, %c0_0] : memref<40x16xf32, #tpu.memory_space<vmem>>, vector<40x16xf32>
    %1 = arith.truncf %0 : vector<40x16xf32> to vector<40x16xbf16>
    %c0_1 = arith.constant 0 : index
    %c0_2 = arith.constant 0 : index
    %2 = vector.load %arg2[%c0_1, %c0_2] : memref<16x128xbf16, #tpu.memory_space<vmem>>, vector<16x128xbf16>
    %cst = arith.constant dense<0.000000e+00> : vector<40x128xf32>
    %3 = tpu.matmul %1, %2, %cst {dimension_numbers = #tpu.dot_dimension_numbers<[1], [0], [0], [1], [0, 0, 1, 1], [], []>} : vector<40x16xbf16>, vector<16x128xbf16>, vector<40x128xf32> -> vector<40x128xf32>
    %c0_3 = arith.constant 0 : index
    %c0_4 = arith.constant 0 : index
    %4 = vector.load %arg3[%c0_3, %c0_4] : memref<1x128xf32, #tpu.memory_space<vmem>>, vector<1x128xf32>
    %5 = vector.broadcast %4 : vector<1x128xf32> to vector<40x128xf32>
    %6 = arith.addf %3, %5 : vector<40x128xf32>
    %cst_5 = arith.constant 0.000000e+00 : f32
    %7 = vector.broadcast %cst_5 : f32 to vector<40x128xf32>
    %8 = arith.maximumf %6, %7 : vector<40x128xf32>
    %9 = arith.truncf %8 : vector<40x128xf32> to vector<40x128xbf16>
    %c0_6 = arith.constant 0 : index
    %c0_7 = arith.constant 0 : index
    %10 = vector.load %arg4[%c0_6, %c0_7] : memref<128x128xbf16, #tpu.memory_space<vmem>>, vector<128x128xbf16>
    %cst_8 = arith.constant dense<0.000000e+00> : vector<40x128xf32>
    %11 = tpu.matmul %9, %10, %cst_8 {dimension_numbers = #tpu.dot_dimension_numbers<[1], [0], [0], [1], [0, 0, 1, 1], [], []>} : vector<40x128xbf16>, vector<128x128xbf16>, vector<40x128xf32> -> vector<40x128xf32>
    %c0_9 = arith.constant 0 : index
    %c0_10 = arith.constant 0 : index
    %12 = vector.load %arg5[%c0_9, %c0_10] : memref<1x128xf32, #tpu.memory_space<vmem>>, vector<1x128xf32>
    %13 = vector.broadcast %12 : vector<1x128xf32> to vector<40x128xf32>
    %14 = arith.addf %11, %13 : vector<40x128xf32>
    %cst_11 = arith.constant 0.000000e+00 : f32
    %15 = vector.broadcast %cst_11 : f32 to vector<40x128xf32>
    %16 = arith.maximumf %14, %15 : vector<40x128xf32>
    %17 = arith.truncf %16 : vector<40x128xf32> to vector<40x128xbf16>
    %c0_12 = arith.constant 0 : index
    %c0_13 = arith.constant 0 : index
    %18 = vector.load %arg6[%c0_12, %c0_13] : memref<128x8xbf16, #tpu.memory_space<vmem>>, vector<128x8xbf16>
    %cst_14 = arith.constant dense<0.000000e+00> : vector<40x8xf32>
    %19 = tpu.matmul %17, %18, %cst_14 {dimension_numbers = #tpu.dot_dimension_numbers<[1], [0], [0], [1], [0, 0, 1, 1], [], []>} : vector<40x128xbf16>, vector<128x8xbf16>, vector<40x8xf32> -> vector<40x8xf32>
    %c0_15 = arith.constant 0 : index
    %c0_16 = arith.constant 0 : index
    %20 = vector.load %arg7[%c0_15, %c0_16] : memref<1x8xf32, #tpu.memory_space<vmem>>, vector<1x8xf32>
    %21 = vector.broadcast %20 : vector<1x8xf32> to vector<40x8xf32>
    %22 = arith.addf %19, %21 : vector<40x8xf32>
    %cst_17 = arith.constant 0.000000e+00 : f32
    %23 = vector.broadcast %cst_17 : f32 to vector<40x8xf32>
    %24 = arith.maximumf %22, %23 : vector<40x8xf32>
    %c0_18 = arith.constant 0 : index
    %c0_19 = arith.constant 0 : index
    %25 = vector.load %arg8[%c0_18, %c0_19] : memref<40x8xf32, #tpu.memory_space<vmem>>, vector<40x8xf32>
    tpu.vector_store %arg8[%c0_18, %c0_19], %24 {strides = array<i32>} : memref<40x8xf32, #tpu.memory_space<vmem>>, vector<40x8xf32>,
    return
  }
  func.func @transform_0(%arg0: i32) -> (i32, i32) {
    %c0_i32 = arith.constant 0 : i32
    %c0_i32_0 = arith.constant 0 : i32
    return %arg0, %c0_i32 : i32, i32
  }
  func.func @transform_1(%arg0: i32) -> (i32, i32) {
    %c0_i32 = arith.constant 0 : i32
    %c0_i32_0 = arith.constant 0 : i32
    %c0_i32_1 = arith.constant 0 : i32
    return %c0_i32, %c0_i32_0 : i32, i32
  }
  func.func @transform_2(%arg0: i32) -> (i32, i32) {
    %c0_i32 = arith.constant 0 : i32
    %c0_i32_0 = arith.constant 0 : i32
    %c0_i32_1 = arith.constant 0 : i32
    return %c0_i32, %c0_i32_0 : i32, i32
  }
  func.func @transform_3(%arg0: i32) -> (i32, i32) {
    %c0_i32 = arith.constant 0 : i32
    %c0_i32_0 = arith.constant 0 : i32
    %c0_i32_1 = arith.constant 0 : i32
    return %c0_i32, %c0_i32_0 : i32, i32
  }
  func.func @transform_4(%arg0: i32) -> (i32, i32) {
    %c0_i32 = arith.constant 0 : i32
    %c0_i32_0 = arith.constant 0 : i32
    %c0_i32_1 = arith.constant 0 : i32
    return %c0_i32, %c0_i32_0 : i32, i32
  }
  func.func @transform_5(%arg0: i32) -> (i32, i32) {
    %c0_i32 = arith.constant 0 : i32
    %c0_i32_0 = arith.constant 0 : i32
    %c0_i32_1 = arith.constant 0 : i32
    return %c0_i32, %c0_i32_0 : i32, i32
  }
  func.func @transform_6(%arg0: i32) -> (i32, i32) {
    %c0_i32 = arith.constant 0 : i32
    %c0_i32_0 = arith.constant 0 : i32
    %c0_i32_1 = arith.constant 0 : i32
    return %c0_i32, %c0_i32_0 : i32, i32
  }
  func.func @transform_7(%arg0: i32) -> (i32, i32) {
    %c0_i32 = arith.constant 0 : i32
    %c0_i32_0 = arith.constant 0 : i32
    return %arg0, %c0_i32 : i32, i32
  }
}

module attributes {stable_mosaic.version = 11 : i64} {
  func.func @_fused_mlp_kernel(%arg0: i32, %arg1: memref<40x16xf32, #tpu.memory_space<vmem>>, %arg2: memref<16x128xbf16, #tpu.memory_space<vmem>>, %arg3: memref<1x128xf32, #tpu.memory_space<vmem>>, %arg4: memref<128x128xbf16, #tpu.memory_space<vmem>>, %arg5: memref<1x128xf32, #tpu.memory_space<vmem>>, %arg6: memref<128x8xbf16, #tpu.memory_space<vmem>>, %arg7: memref<1x8xf32, #tpu.memory_space<vmem>>, %arg8: memref<40x8xf32, #tpu.memory_space<vmem>>) attributes {dimension_semantics = [#tpu.dimension_semantics<parallel>], iteration_bounds = array<i64: 1>, scalar_prefetch = 0 : i64, scratch_operands = 0 : i64, tpu.core_type = #tpu.core_type<tc>, window_params = [{transform_indices = @transform_0, window_bounds = array<i64: 40, 16>}, {pipeline_mode = #tpu.pipeline_mode<synchronous>, transform_indices = @transform_1, window_bounds = array<i64: 16, 128>}, {pipeline_mode = #tpu.pipeline_mode<synchronous>, transform_indices = @transform_2, window_bounds = array<i64: 1, 128>}, {pipeline_mode = #tpu.pipeline_mode<synchronous>, transform_indices = @transform_3, window_bounds = array<i64: 128, 128>}, {pipeline_mode = #tpu.pipeline_mode<synchronous>, transform_indices = @transform_4, window_bounds = array<i64: 1, 128>}, {pipeline_mode = #tpu.pipeline_mode<synchronous>, transform_indices = @transform_5, window_bounds = array<i64: 128, 8>}, {pipeline_mode = #tpu.pipeline_mode<synchronous>, transform_indices = @transform_6, window_bounds = array<i64: 1, 8>}, {transform_indices = @transform_7, window_bounds = array<i64: 40, 8>}]} {
    %c0 = arith.constant 0 : index
    %c0_0 = arith.constant 0 : index
    %0 = vector.load %arg1[%c0, %c0_0] : memref<40x16xf32, #tpu.memory_space<vmem>>, vector<40x16xf32>
    %1 = arith.truncf %0 : vector<40x16xf32> to vector<40x16xbf16>
    %c0_1 = arith.constant 0 : index
    %c0_2 = arith.constant 0 : index
    %2 = vector.load %arg2[%c0_1, %c0_2] : memref<16x128xbf16, #tpu.memory_space<vmem>>, vector<16x128xbf16>
    %cst = arith.constant dense<0.000000e+00> : vector<40x128xf32>
    %3 = tpu.matmul %1, %2, %cst {dimension_numbers = #tpu.dot_dimension_numbers<[1], [0], [0], [1], [0, 0, 1, 1], [], []>} : vector<40x16xbf16>, vector<16x128xbf16>, vector<40x128xf32> -> vector<40x128xf32>
    %c0_3 = arith.constant 0 : index
    %c0_4 = arith.constant 0 : index
    %4 = vector.load %arg3[%c0_3, %c0_4] : memref<1x128xf32, #tpu.memory_space<vmem>>, vector<1x128xf32>
    %5 = vector.broadcast %4 : vector<1x128xf32> to vector<40x128xf32>
    %6 = arith.addf %3, %5 : vector<40x128xf32>
    %cst_5 = arith.constant 0.000000e+00 : f32
    %7 = vector.broadcast %cst_5 : f32 to vector<40x128xf32>
    %8 = arith.maximumf %6, %7 : vector<40x128xf32>
    %9 = arith.truncf %8 : vector<40x128xf32> to vector<40x128xbf16>
    %c0_6 = arith.constant 0 : index
    %c0_7 = arith.constant 0 : index
    %10 = vector.load %arg4[%c0_6, %c0_7] : memref<128x128xbf16, #tpu.memory_space<vmem>>, vector<128x128xbf16>
    %cst_8 = arith.constant dense<0.000000e+00> : vector<40x128xf32>
    %11 = tpu.matmul %9, %10, %cst_8 {dimension_numbers = #tpu.dot_dimension_numbers<[1], [0], [0], [1], [0, 0, 1, 1], [], []>} : vector<40x128xbf16>, vector<128x128xbf16>, vector<40x128xf32> -> vector<40x128xf32>
    %c0_9 = arith.constant 0 : index
    %c0_10 = arith.constant 0 : index
    %12 = vector.load %arg5[%c0_9, %c0_10] : memref<1x128xf32, #tpu.memory_space<vmem>>, vector<1x128xf32>
    %13 = vector.broadcast %12 : vector<1x128xf32> to vector<40x128xf32>
    %14 = arith.addf %11, %13 : vector<40x128xf32>
    %cst_11 = arith.constant 0.000000e+00 : f32
    %15 = vector.broadcast %cst_11 : f32 to vector<40x128xf32>
    %16 = arith.maximumf %14, %15 : vector<40x128xf32>
    %17 = arith.truncf %16 : vector<40x128xf32> to vector<40x128xbf16>
    %c0_12 = arith.constant 0 : index
    %c0_13 = arith.constant 0 : index
    %18 = vector.load %arg6[%c0_12, %c0_13] : memref<128x8xbf16, #tpu.memory_space<vmem>>, vector<128x8xbf16>
    %cst_14 = arith.constant dense<0.000000e+00> : vector<40x8xf32>
    %19 = tpu.matmul %17, %18, %cst_14 {dimension_numbers = #tpu.dot_dimension_numbers<[1], [0], [0], [1], [0, 0, 1, 1], [], []>} : vector<40x128xbf16>, vector<128x8xbf16>, vector<40x8xf32> -> vector<40x8xf32>
    %c0_15 = arith.constant 0 : index
    %c0_16 = arith.constant 0 : index
    %20 = vector.load %arg7[%c0_15, %c0_16] : memref<1x8xf32, #tpu.memory_space<vmem>>, vector<1x8xf32>
    %21 = vector.broadcast %20 : vector<1x8xf32> to vector<40x8xf32>
    %22 = arith.addf %19, %21 : vector<40x8xf32>
    %cst_17 = arith.constant 0.000000e+00 : f32
    %23 = vector.broadcast %cst_17 : f32 to vector<40x8xf32>
    %24 = arith.maximumf %22, %23 : vector<40x8xf32>
    %c0_18 = arith.constant 0 : index
    %c0_19 = arith.constant 0 : index
    %25 = vector.load %arg8[%c0_18, %c0_19] : memref<40x8xf32, #tpu.memory_space<vmem>>, vector<40x8xf32>
    tpu.vector_store %arg8[%c0_18, %c0_19], %24 {strides = array<i32>} : memref<40x8xf32, #tpu.memory_space<vmem>>, vector<40x8xf32>,
    return
  }
  func.func @transform_0(%arg0: i32) -> (i32, i32) {
    %c0_i32 = arith.constant 0 : i32
    %c0_i32_0 = arith.constant 0 : i32
    return %arg0, %c0_i32 : i32, i32
  }
  func.func @transform_1(%arg0: i32) -> (i32, i32) {
    %c0_i32 = arith.constant 0 : i32
    %c0_i32_0 = arith.constant 0 : i32
    %c0_i32_1 = arith.constant 0 : i32
    return %c0_i32, %c0_i32_0 : i32, i32
  }
  func.func @transform_2(%arg0: i32) -> (i32, i32) {
    %c0_i32 = arith.constant 0 : i32
    %c0_i32_0 = arith.constant 0 : i32
    %c0_i32_1 = arith.constant 0 : i32
    return %c0_i32, %c0_i32_0 : i32, i32
  }
  func.func @transform_3(%arg0: i32) -> (i32, i32) {
    %c0_i32 = arith.constant 0 : i32
    %c0_i32_0 = arith.constant 0 : i32
    %c0_i32_1 = arith.constant 0 : i32
    return %c0_i32, %c0_i32_0 : i32, i32
  }
  func.func @transform_4(%arg0: i32) -> (i32, i32) {
    %c0_i32 = arith.constant 0 : i32
    %c0_i32_0 = arith.constant 0 : i32
    %c0_i32_1 = arith.constant 0 : i32
    return %c0_i32, %c0_i32_0 : i32, i32
  }
  func.func @transform_5(%arg0: i32) -> (i32, i32) {
    %c0_i32 = arith.constant 0 : i32
    %c0_i32_0 = arith.constant 0 : i32
    %c0_i32_1 = arith.constant 0 : i32
    return %c0_i32, %c0_i32_0 : i32, i32
  }
  func.func @transform_6(%arg0: i32) -> (i32, i32) {
    %c0_i32 = arith.constant 0 : i32
    %c0_i32_0 = arith.constant 0 : i32
    %c0_i32_1 = arith.constant 0 : i32
    return %c0_i32, %c0_i32_0 : i32, i32
  }
  func.func @transform_7(%arg0: i32) -> (i32, i32) {
    %c0_i32 = arith.constant 0 : i32
    %c0_i32_0 = arith.constant 0 : i32
    return %arg0, %c0_i32 : i32, i32
  }
}

</mosaic_0001>

<bundles_post_ra>
// kernel: nerv_mlp.1
= control target key start
LH: loop header
LB: loop body
LE: loop exit
PB: predicated region body
PF: predicated region fallthrough
CT: control target
= control target key end

     0   :  { %v539_v0 = vmov 0.0   ;;  %vm540_vm0 = vmmov 0   ;;  %vm50_vm1 = vcmask 130048   ;;  %vm391_vm2 = vcmask 64512   ;;  %s714_s1 = inlined_call_operand.vmem [shape: bf16[16,128], index: 1, kind: input, shape index: {}]   ;;  %s715_s0 = inlined_call_operand.vmem [shape: f32[40,16], index: 0, kind: input, shape index: {}]   ;;  %s716_s3 = inlined_call_operand.vmem [shape: bf16[128,128], index: 3, kind: input, shape index: {}]   ;;  %s717_s5 = inlined_call_operand.vmem [shape: bf16[128,8], index: 5, kind: input, shape index: {}]   ;;  %s718_s2 = inlined_call_operand.vmem [shape: f32[1,128], index: 2, kind: input, shape index: {}]   ;;  %s719_s4 = inlined_call_operand.vmem [shape: f32[1,128], index: 4, kind: input, shape index: {}]   ;;  %s720_s6 = inlined_call_operand.vmem [shape: f32[1,8], index: 6, kind: input, shape index: {}]   ;;  %s721_s7 = inlined_call_operand.vmem [shape: f32[40,8], index: 7, kind: output, shape index: {}]  }
   0x1   :  { %450 = vmatprep.subr.bf16.mxu0 %v539_v0  ;;  %v522_v1 = vld [vmem:[%s714_s1] sm:$0xff]   ;;  %452 = vmatprep.mubr.msk.bf16.mxu0 %vm540_vm0, %v539_v0  ;;  %v28_v3 = vld [vmem:[%s715_s0 + $0x8] sm:$0xff]  ;;  %v29_v6 = vld [vmem:[%s715_s0 + $0x10] sm:$0xff] }
   0x2   :  { %v27_v2 = vld [vmem:[%s715_s0] sm:$0xff]  ;;  %464 = vmatprep.subr.bf16.mxu1 %v539_v0  ;;  %480 = vmatprep.mubr.msk.bf16.mxu1 %vm540_vm0, %v539_v0  ;;  %v524_v7 = vld [vmem:[%s716_s3 + $0x8] sm:$0xff]   ;;  %v30_v8 = vld [vmem:[%s715_s0 + $0x18] sm:$0xff] }
   0x3   :  { %451 = vmatpush3.bf16.msra.mxu0 %v522_v1  ;;  %v32_v4 = vpack.c.bf16 %v28_v3, %v27_v2  ;;  %v523_v5 = vld [vmem:[%s716_s3] sm:$0xff]   ;;  %v525_v9 = vld [vmem:[%s716_s3 + $0x10] sm:$0xff]   ;;  %v33_v10 = vpack.c.bf16 %v30_v8, %v29_v6  ;;  %v526_v11 = vld [vmem:[%s716_s3 + $0x18] sm:$0xff]  }
   0x4   :  { %492 = vmatprep.subr.bf16.mxu0 %v539_v0  ;;  %465 = vmatpush3.bf16.msra.mxu1 %v523_v5  ;;  %v31_v12 = vld [vmem:[%s715_s0 + $0x20] sm:$0xff]  ;;  %v528_v15 = vld [vmem:[%s716_s3 + $0x28] sm:$0xff]   ;;  %v529_v16 = vld [vmem:[%s716_s3 + $0x30] sm:$0xff]  }
   0x5   :  { %466 = vmatprep.subr.bf16.mxu1 %v539_v0  ;;  %v34_v13 = vpack.c.bf16 %v31_v12, %v31_v12  ;;  %v527_v14 = vld [vmem:[%s716_s3 + $0x20] sm:$0xff]   ;;  %v530_v17 = vld [vmem:[%s716_s3 + $0x38] sm:$0xff]   ;;  %v532_v19 = vld [vmem:[%s717_s5 + $0x8] sm:$0xff]  }
   0x6   :  { %453 = vmatmul.mubr.msk.bf16.vlgmr.msra.gmra.mrb[0].mxu0 %vm50_vm1, %v32_v4  ;;  %v531_v18 = vld [vmem:[%s717_s5] sm:$0xff]   ;;  %v533_v20 = vld [vmem:[%s717_s5 + $0x10] sm:$0xff]   ;;  %v534_v21 = vld [vmem:[%s717_s5 + $0x18] sm:$0xff]  }
   0x7   :  { %456 = vmatprep.mubr.msk.bf16.mxu0 %vm540_vm0, %v539_v0  ;;  %493 = vmatpush3.bf16.msra.mxu0 %v531_v18  ;;  %v535_v22 = vld [vmem:[%s717_s5 + $0x20] sm:$0xff]   ;;  %v536_v23 = vld [vmem:[%s717_s5 + $0x28] sm:$0xff]   ;;  %v537_v50 = vld [vmem:[%s717_s5 + $0x30] sm:$0xff]  }
   0x8   :  { %467 = vmatpush3.bf16.msra.mxu1 %v524_v7  ;;  %494 = vmatprep.subr.bf16.mxu0 %v539_v0  ;;  %v401_v24 = vld [vmem:[%s718_s2] ss:$0 sm:$0xff]  ;;  %v538_v51 = vld [vmem:[%s717_s5 + $0x38] sm:$0xff]  }
   0x9   :  { %468 = vmatprep.subr.bf16.mxu1 %v539_v0  ;;  %v406_v52 = vld [vmem:[%s719_s4] ss:$0 sm:$0xff] }
   0xb   :  { %495 = vmatpush3.bf16.msra.mxu0 %v532_v19 }
   0xc   :  { %469 = vmatpush3.bf16.msra.mxu1 %v525_v9  ;;  %496 = vmatprep.subr.bf16.mxu0 %v539_v0 }
   0xd   :  { %470 = vmatprep.subr.bf16.mxu1 %v539_v0 }
   0xe   :  { %457 = vmatmul.mubr.msk.bf16.gmra.mrb[4].mxu0 %vm50_vm1, %v33_v10 }
   0xf   :  { %460 = vmatprep.mubr.msk.bf16.mxu0 %vm540_vm0, %v539_v0  ;;  %497 = vmatpush3.bf16.msra.mxu0 %v533_v20 }
  0x10   :  { %471 = vmatpush3.bf16.msra.mxu1 %v526_v11  ;;  %498 = vmatprep.subr.bf16.mxu0 %v539_v0 }
  0x11   :  { %472 = vmatprep.subr.bf16.mxu1 %v539_v0 }
  0x13   :  { %499 = vmatpush3.bf16.msra.mxu0 %v534_v21 }
  0x14   :  { %473 = vmatpush3.bf16.msra.mxu1 %v527_v14  ;;  %500 = vmatprep.subr.bf16.mxu0 %v539_v0 }
  0x15   :  { %474 = vmatprep.subr.bf16.mxu1 %v539_v0 }
  0x16   :  { %461 = vmatmul.mubr.msk.bf16.gmra.mrb[8].mxu0 %vm50_vm1, %v34_v13 }
  0x17   :  { %508 = vmatprep.mubr.msk.bf16.mxu0 %vm540_vm0, %v539_v0  ;;  %501 = vmatpush3.bf16.msra.mxu0 %v535_v22 }
  0x18   :  { %475 = vmatpush3.bf16.msra.mxu1 %v528_v15  ;;  %502 = vmatprep.subr.bf16.mxu0 %v539_v0  ;;  %v415_v15 = vld [vmem:[%s720_s6] ss:$0 sm:$0xff] }
  0x19   :  { %476 = vmatprep.subr.bf16.mxu1 %v539_v0 }
  0x1b   :  { %503 = vmatpush3.bf16.msra.mxu0 %v536_v23 }
  0x1c   :  { %477 = vmatpush3.bf16.msra.mxu1 %v529_v16  ;;  %504 = vmatprep.subr.bf16.mxu0 %v539_v0 }
  0x1d   :  { %478 = vmatprep.subr.bf16.mxu1 %v539_v0 }
  0x1f   :  { %505 = vmatpush3.bf16.msra.mxu0 %v537_v50 }
  0x20   :  { %479 = vmatpush3.bf16.msra.mxu1 %v530_v17  ;;  %506 = vmatprep.subr.bf16.mxu0 %v539_v0 }
  0x23   :  { %507 = vmatpush3.bf16.msra.mxu0 %v538_v51 }
  0xd9   :  { %v94_v25 = vpop.f32.mrb[0].mxu0 }
  0xda   :  { %v95_v26 = vadd.f32 %v401_v24, %v94_v25  ;;  %v454_v27 = vpop.f32.mrb[1].mxu0 }
  0xdb   :  { %v97_v28 = vpop.f32.mrb[2].mxu0 }
  0xdc   :  { %v98_v29 = vadd.f32 %v401_v24, %v97_v28  ;;  %v455_v30 = vpop.f32.mrb[3].mxu0  ;;  %v116_v31 = vmax.f32 %v95_v26, 0.0 }
  0xde   :  { %v117_v32 = vmax.f32 %v98_v29, 0.0 }
  0xe0   :  { %v121_v33 = vpack.c.bf16 %v117_v32, %v116_v31 }
  0xe1   :  { %v102_v34 = vpop.f32.mrb[4].mxu0 }
  0xe2   :  { %v103_v35 = vadd.f32 %v401_v24, %v102_v34  ;;  %v458_v36 = vpop.f32.mrb[5].mxu0  ;;  %481 = vmatmul.mubr.bf16.vlgmr.msra.gmra.mrb[0].mxu1 %v121_v33 }
  0xe3   :  { %v105_v37 = vpop.f32.mrb[6].mxu0  ;;  %484 = vmatprep.mubr.msk.bf16.mxu1 %vm540_vm0, %v539_v0 }
  0xe4   :  { %v106_v38 = vadd.f32 %v401_v24, %v105_v37  ;;  %v459_v39 = vpop.f32.mrb[7].mxu0  ;;  %v118_v40 = vmax.f32 %v103_v35, 0.0 }
  0xe6   :  { %v119_v41 = vmax.f32 %v106_v38, 0.0 }
  0xe8   :  { %v122_v42 = vpack.c.bf16 %v119_v41, %v118_v40 }
  0xe9   :  { %v110_v43 = vpop.f32.mrb[8].mxu0 }
  0xea   :  { %v111_v44 = vadd.f32 %v401_v24, %v110_v43  ;;  %485 = vmatmul.mubr.bf16.gmra.mrb[4].mxu1 %v122_v42  ;;  %v462_v45 = vpop.f32.mrb[9].mxu0 }
  0xeb   :  { %v113_v46 = vpop.f32.mrb[10].mxu0  ;;  %488 = vmatprep.mubr.msk.bf16.mxu1 %vm540_vm0, %v539_v0 }
  0xec   :  { %v120_v47 = vmax.f32 %v111_v44, 0.0  ;;  %v463_v48 = vpop.f32.mrb[11].mxu0 }
  0xee   :  { %v123_v49 = vpack.c.bf16 %v120_v47, %v120_v47 }
  0xf2   :  { %489 = vmatmul.mubr.bf16.gmra.mrb[8].mxu1 %v123_v49 }
 0x1b5   :  { %v229_v53 = vpop.f32.mrb[0].mxu1 }
 0x1b6   :  { %v230_v54 = vadd.f32 %v406_v52, %v229_v53  ;;  %v482_v55 = vpop.f32.mrb[1].mxu1 }
 0x1b7   :  { %v232_v56 = vpop.f32.mrb[2].mxu1 }
 0x1b8   :  { %v233_v57 = vadd.f32 %v406_v52, %v232_v56  ;;  %v483_v58 = vpop.f32.mrb[3].mxu1  ;;  %v251_v59 = vmax.f32 %v230_v54, 0.0 }
 0x1ba   :  { %v252_v60 = vmax.f32 %v233_v57, 0.0 }
 0x1bc   :  { %v256_v61 = vpack.c.bf16 %v252_v60, %v251_v59 }
 0x1bd   :  { %v237_v62 = vpop.f32.mrb[4].mxu1 }
 0x1be   :  { %v238_v63 = vadd.f32 %v406_v52, %v237_v62  ;;  %v486_v1 = vpop.f32.mrb[5].mxu1  ;;  %509 = vmatmul.mubr.bf16.vlgmr.msra.gmra.mrb[12].mxu0 %v256_v61 }
 0x1bf   :  { %v240_v2 = vpop.f32.mrb[6].mxu1  ;;  %512 = vmatprep.mubr.msk.bf16.mxu0 %vm540_vm0, %v539_v0 }
 0x1c0   :  { %v241_v3 = vadd.f32 %v406_v52, %v240_v2  ;;  %v487_v4 = vpop.f32.mrb[7].mxu1  ;;  %v253_v5 = vmax.f32 %v238_v63, 0.0 }
 0x1c2   :  { %v254_v6 = vmax.f32 %v241_v3, 0.0 }
 0x1c4   :  { %v257_v7 = vpack.c.bf16 %v254_v6, %v253_v5 }
 0x1c5   :  { %v245_v8 = vpop.f32.mrb[8].mxu1 }
 0x1c6   :  { %v246_v9 = vadd.f32 %v406_v52, %v245_v8  ;;  %v490_v10 = vpop.f32.mrb[9].mxu1  ;;  %513 = vmatmul.mubr.bf16.gmra.mrb[16].mxu0 %v257_v7 }
 0x1c7   :  { %v248_v11 = vpop.f32.mrb[10].mxu1  ;;  %516 = vmatprep.mubr.msk.bf16.mxu0 %vm540_vm0, %v539_v0 }
 0x1c8   :  { %v255_v12 = vmax.f32 %v246_v9, 0.0  ;;  %v491_v13 = vpop.f32.mrb[11].mxu1 }
 0x1ca   :  { %v258_v14 = vpack.c.bf16 %v255_v12, %v255_v12 }
 0x1ce   :  { %517 = vmatmul.mubr.bf16.gmra.mrb[20].mxu0 %v258_v14 }
 0x291   :  { %v364_v16 = vpop.f32.mrb[12].mxu0 }
 0x292   :  { %v365_v17 = vadd.f32 %v415_v15, %v364_v16  ;;  %v510_v18 = vpop.f32.mrb[13].mxu0 }
 0x293   :  { %v367_v19 = vpop.f32.mrb[14].mxu0 }
 0x294   :  { %v386_v20 = vmax.f32 %v365_v17, 0.0  ;;  %v368_v21 = vadd.f32 %v415_v15, %v367_v19  ;;  %v511_v22 = vpop.f32.mrb[15].mxu0 }
 0x296   :  { %392 = vst.msk [vmem:[%s721_s7] sm:$0xff] %vm391_vm2, %v386_v20  ;;  %v387_v0 = vmax.f32 %v368_v21, 0.0 }
 0x298   :  { %393 = vst.msk [vmem:[%s721_s7 + $0x8] sm:$0xff] %vm391_vm2, %v387_v0 }
 0x299   :  { %v372_v23 = vpop.f32.mrb[16].mxu0 }
 0x29a   :  { %v373_v24 = vadd.f32 %v415_v15, %v372_v23  ;;  %v514_v25 = vpop.f32.mrb[17].mxu0 }
 0x29b   :  { %v375_v26 = vpop.f32.mrb[18].mxu0 }
 0x29c   :  { %v388_v27 = vmax.f32 %v373_v24, 0.0  ;;  %v376_v28 = vadd.f32 %v415_v15, %v375_v26  ;;  %v515_v29 = vpop.f32.mrb[19].mxu0 }
 0x29e   :  { %394 = vst.msk [vmem:[%s721_s7 + $0x10] sm:$0xff] %vm391_vm2, %v388_v27  ;;  %v389_v30 = vmax.f32 %v376_v28, 0.0 }
 0x2a0   :  { %395 = vst.msk [vmem:[%s721_s7 + $0x18] sm:$0xff] %vm391_vm2, %v389_v30 }
 0x2a1   :  { %v380_v31 = vpop.f32.mrb[20].mxu0 }
 0x2a2   :  { %v381_v32 = vadd.f32 %v415_v15, %v380_v31  ;;  %v518_v33 = vpop.f32.mrb[21].mxu0 }
 0x2a3   :  { %v383_v34 = vpop.f32.mrb[22].mxu0 }
 0x2a4   :  { %v390_v35 = vmax.f32 %v381_v32, 0.0  ;;  %v519_v36 = vpop.f32.mrb[23].mxu0 }
 0x2a6   :  { %396 = vst.msk [vmem:[%s721_s7 + $0x20] sm:$0xff] %vm391_vm2, %v390_v35 }

// kernel: nerv_mlp.1
= control target key start
LH: loop header
LB: loop body
LE: loop exit
PB: predicated region body
PF: predicated region fallthrough
CT: control target
= control target key end

     0   :  { %v539_v0 = vmov 0.0   ;;  %vm540_vm0 = vmmov 0   ;;  %vm50_vm1 = vcmask 130048   ;;  %vm391_vm2 = vcmask 64512   ;;  %s714_s1 = inlined_call_operand.vmem [shape: bf16[16,128], index: 1, kind: input, shape index: {}]   ;;  %s715_s0 = inlined_call_operand.vmem [shape: f32[40,16], index: 0, kind: input, shape index: {}]   ;;  %s716_s3 = inlined_call_operand.vmem [shape: bf16[128,128], index: 3, kind: input, shape index: {}]   ;;  %s717_s5 = inlined_call_operand.vmem [shape: bf16[128,8], index: 5, kind: input, shape index: {}]   ;;  %s718_s2 = inlined_call_operand.vmem [shape: f32[1,128], index: 2, kind: input, shape index: {}]   ;;  %s719_s4 = inlined_call_operand.vmem [shape: f32[1,128], index: 4, kind: input, shape index: {}]   ;;  %s720_s6 = inlined_call_operand.vmem [shape: f32[1,8], index: 6, kind: input, shape index: {}]   ;;  %s721_s7 = inlined_call_operand.vmem [shape: f32[40,8], index: 7, kind: output, shape index: {}]  }
   0x1   :  { %450 = vmatprep.subr.bf16.mxu0 %v539_v0  ;;  %v522_v1 = vld [vmem:[%s714_s1] sm:$0xff]   ;;  %452 = vmatprep.mubr.msk.bf16.mxu0 %vm540_vm0, %v539_v0  ;;  %v28_v3 = vld [vmem:[%s715_s0 + $0x8] sm:$0xff]  ;;  %v29_v6 = vld [vmem:[%s715_s0 + $0x10] sm:$0xff] }
   0x2   :  { %v27_v2 = vld [vmem:[%s715_s0] sm:$0xff]  ;;  %464 = vmatprep.subr.bf16.mxu1 %v539_v0  ;;  %480 = vmatprep.mubr.msk.bf16.mxu1 %vm540_vm0, %v539_v0  ;;  %v524_v7 = vld [vmem:[%s716_s3 + $0x8] sm:$0xff]   ;;  %v30_v8 = vld [vmem:[%s715_s0 + $0x18] sm:$0xff] }
   0x3   :  { %451 = vmatpush3.bf16.msra.mxu0 %v522_v1  ;;  %v32_v4 = vpack.c.bf16 %v28_v3, %v27_v2  ;;  %v523_v5 = vld [vmem:[%s716_s3] sm:$0xff]   ;;  %v525_v9 = vld [vmem:[%s716_s3 + $0x10] sm:$0xff]   ;;  %v33_v10 = vpack.c.bf16 %v30_v8, %v29_v6  ;;  %v526_v11 = vld [vmem:[%s716_s3 + $0x18] sm:$0xff]  }
   0x4   :  { %492 = vmatprep.subr.bf16.mxu0 %v539_v0  ;;  %465 = vmatpush3.bf16.msra.mxu1 %v523_v5  ;;  %v31_v12 = vld [vmem:[%s715_s0 + $0x20] sm:$0xff]  ;;  %v528_v15 = vld [vmem:[%s716_s3 + $0x28] sm:$0xff]   ;;  %v529_v16 = vld [vmem:[%s716_s3 + $0x30] sm:$0xff]  }
   0x5   :  { %466 = vmatprep.subr.bf16.mxu1 %v539_v0  ;;  %v34_v13 = vpack.c.bf16 %v31_v12, %v31_v12  ;;  %v527_v14 = vld [vmem:[%s716_s3 + $0x20] sm:$0xff]   ;;  %v530_v17 = vld [vmem:[%s716_s3 + $0x38] sm:$0xff]   ;;  %v532_v19 = vld [vmem:[%s717_s5 + $0x8] sm:$0xff]  }
   0x6   :  { %453 = vmatmul.mubr.msk.bf16.vlgmr.msra.gmra.mrb[0].mxu0 %vm50_vm1, %v32_v4  ;;  %v531_v18 = vld [vmem:[%s717_s5] sm:$0xff]   ;;  %v533_v20 = vld [vmem:[%s717_s5 + $0x10] sm:$0xff]   ;;  %v534_v21 = vld [vmem:[%s717_s5 + $0x18] sm:$0xff]  }
   0x7   :  { %456 = vmatprep.mubr.msk.bf16.mxu0 %vm540_vm0, %v539_v0  ;;  %493 = vmatpush3.bf16.msra.mxu0 %v531_v18  ;;  %v535_v22 = vld [vmem:[%s717_s5 + $0x20] sm:$0xff]   ;;  %v536_v23 = vld [vmem:[%s717_s5 + $0x28] sm:$0xff]   ;;  %v537_v50 = vld [vmem:[%s717_s5 + $0x30] sm:$0xff]  }
   0x8   :  { %467 = vmatpush3.bf16.msra.mxu1 %v524_v7  ;;  %494 = vmatprep.subr.bf16.mxu0 %v539_v0  ;;  %v401_v24 = vld [vmem:[%s718_s2] ss:$0 sm:$0xff]  ;;  %v538_v51 = vld [vmem:[%s717_s5 + $0x38] sm:$0xff]  }
   0x9   :  { %468 = vmatprep.subr.bf16.mxu1 %v539_v0  ;;  %v406_v52 = vld [vmem:[%s719_s4] ss:$0 sm:$0xff] }
   0xb   :  { %495 = vmatpush3.bf16.msra.mxu0 %v532_v19 }
   0xc   :  { %469 = vmatpush3.bf16.msra.mxu1 %v525_v9  ;;  %496 = vmatprep.subr.bf16.mxu0 %v539_v0 }
   0xd   :  { %470 = vmatprep.subr.bf16.mxu1 %v539_v0 }
   0xe   :  { %457 = vmatmul.mubr.msk.bf16.gmra.mrb[4].mxu0 %vm50_vm1, %v33_v10 }
   0xf   :  { %460 = vmatprep.mubr.msk.bf16.mxu0 %vm540_vm0, %v539_v0  ;;  %497 = vmatpush3.bf16.msra.mxu0 %v533_v20 }
  0x10   :  { %471 = vmatpush3.bf16.msra.mxu1 %v526_v11  ;;  %498 = vmatprep.subr.bf16.mxu0 %v539_v0 }
  0x11   :  { %472 = vmatprep.subr.bf16.mxu1 %v539_v0 }
  0x13   :  { %499 = vmatpush3.bf16.msra.mxu0 %v534_v21 }
  0x14   :  { %473 = vmatpush3.bf16.msra.mxu1 %v527_v14  ;;  %500 = vmatprep.subr.bf16.mxu0 %v539_v0 }
  0x15   :  { %474 = vmatprep.subr.bf16.mxu1 %v539_v0 }
  0x16   :  { %461 = vmatmul.mubr.msk.bf16.gmra.mrb[8].mxu0 %vm50_vm1, %v34_v13 }
  0x17   :  { %508 = vmatprep.mubr.msk.bf16.mxu0 %vm540_vm0, %v539_v0  ;;  %501 = vmatpush3.bf16.msra.mxu0 %v535_v22 }
  0x18   :  { %475 = vmatpush3.bf16.msra.mxu1 %v528_v15  ;;  %502 = vmatprep.subr.bf16.mxu0 %v539_v0  ;;  %v415_v15 = vld [vmem:[%s720_s6] ss:$0 sm:$0xff] }
  0x19   :  { %476 = vmatprep.subr.bf16.mxu1 %v539_v0 }
  0x1b   :  { %503 = vmatpush3.bf16.msra.mxu0 %v536_v23 }
  0x1c   :  { %477 = vmatpush3.bf16.msra.mxu1 %v529_v16  ;;  %504 = vmatprep.subr.bf16.mxu0 %v539_v0 }
  0x1d   :  { %478 = vmatprep.subr.bf16.mxu1 %v539_v0 }
  0x1f   :  { %505 = vmatpush3.bf16.msra.mxu0 %v537_v50 }
  0x20   :  { %479 = vmatpush3.bf16.msra.mxu1 %v530_v17  ;;  %506 = vmatprep.subr.bf16.mxu0 %v539_v0 }
  0x23   :  { %507 = vmatpush3.bf16.msra.mxu0 %v538_v51 }
  0xd9   :  { %v94_v25 = vpop.f32.mrb[0].mxu0 }
  0xda   :  { %v95_v26 = vadd.f32 %v401_v24, %v94_v25  ;;  %v454_v27 = vpop.f32.mrb[1].mxu0 }
  0xdb   :  { %v97_v28 = vpop.f32.mrb[2].mxu0 }
  0xdc   :  { %v98_v29 = vadd.f32 %v401_v24, %v97_v28  ;;  %v455_v30 = vpop.f32.mrb[3].mxu0  ;;  %v116_v31 = vmax.f32 %v95_v26, 0.0 }
  0xde   :  { %v117_v32 = vmax.f32 %v98_v29, 0.0 }
  0xe0   :  { %v121_v33 = vpack.c.bf16 %v117_v32, %v116_v31 }
  0xe1   :  { %v102_v34 = vpop.f32.mrb[4].mxu0 }
  0xe2   :  { %v103_v35 = vadd.f32 %v401_v24, %v102_v34  ;;  %v458_v36 = vpop.f32.mrb[5].mxu0  ;;  %481 = vmatmul.mubr.bf16.vlgmr.msra.gmra.mrb[0].mxu1 %v121_v33 }
  0xe3   :  { %v105_v37 = vpop.f32.mrb[6].mxu0  ;;  %484 = vmatprep.mubr.msk.bf16.mxu1 %vm540_vm0, %v539_v0 }
  0xe4   :  { %v106_v38 = vadd.f32 %v401_v24, %v105_v37  ;;  %v459_v39 = vpop.f32.mrb[7].mxu0  ;;  %v118_v40 = vmax.f32 %v103_v35, 0.0 }
  0xe6   :  { %v119_v41 = vmax.f32 %v106_v38, 0.0 }
  0xe8   :  { %v122_v42 = vpack.c.bf16 %v119_v41, %v118_v40 }
  0xe9   :  { %v110_v43 = vpop.f32.mrb[8].mxu0 }
  0xea   :  { %v111_v44 = vadd.f32 %v401_v24, %v110_v43  ;;  %485 = vmatmul.mubr.bf16.gmra.mrb[4].mxu1 %v122_v42  ;;  %v462_v45 = vpop.f32.mrb[9].mxu0 }
  0xeb   :  { %v113_v46 = vpop.f32.mrb[10].mxu0  ;;  %488 = vmatprep.mubr.msk.bf16.mxu1 %vm540_vm0, %v539_v0 }
  0xec   :  { %v120_v47 = vmax.f32 %v111_v44, 0.0  ;;  %v463_v48 = vpop.f32.mrb[11].mxu0 }
  0xee   :  { %v123_v49 = vpack.c.bf16 %v120_v47, %v120_v47 }
  0xf2   :  { %489 = vmatmul.mubr.bf16.gmra.mrb[8].mxu1 %v123_v49 }
 0x1b5   :  { %v229_v53 = vpop.f32.mrb[0].mxu1 }
 0x1b6   :  { %v230_v54 = vadd.f32 %v406_v52, %v229_v53  ;;  %v482_v55 = vpop.f32.mrb[1].mxu1 }
 0x1b7   :  { %v232_v56 = vpop.f32.mrb[2].mxu1 }
 0x1b8   :  { %v233_v57 = vadd.f32 %v406_v52, %v232_v56  ;;  %v483_v58 = vpop.f32.mrb[3].mxu1  ;;  %v251_v59 = vmax.f32 %v230_v54, 0.0 }
 0x1ba   :  { %v252_v60 = vmax.f32 %v233_v57, 0.0 }
 0x1bc   :  { %v256_v61 = vpack.c.bf16 %v252_v60, %v251_v59 }
 0x1bd   :  { %v237_v62 = vpop.f32.mrb[4].mxu1 }
 0x1be   :  { %v238_v63 = vadd.f32 %v406_v52, %v237_v62  ;;  %v486_v1 = vpop.f32.mrb[5].mxu1  ;;  %509 = vmatmul.mubr.bf16.vlgmr.msra.gmra.mrb[12].mxu0 %v256_v61 }
 0x1bf   :  { %v240_v2 = vpop.f32.mrb[6].mxu1  ;;  %512 = vmatprep.mubr.msk.bf16.mxu0 %vm540_vm0, %v539_v0 }
 0x1c0   :  { %v241_v3 = vadd.f32 %v406_v52, %v240_v2  ;;  %v487_v4 = vpop.f32.mrb[7].mxu1  ;;  %v253_v5 = vmax.f32 %v238_v63, 0.0 }
 0x1c2   :  { %v254_v6 = vmax.f32 %v241_v3, 0.0 }
 0x1c4   :  { %v257_v7 = vpack.c.bf16 %v254_v6, %v253_v5 }
 0x1c5   :  { %v245_v8 = vpop.f32.mrb[8].mxu1 }
 0x1c6   :  { %v246_v9 = vadd.f32 %v406_v52, %v245_v8  ;;  %v490_v10 = vpop.f32.mrb[9].mxu1  ;;  %513 = vmatmul.mubr.bf16.gmra.mrb[16].mxu0 %v257_v7 }
 0x1c7   :  { %v248_v11 = vpop.f32.mrb[10].mxu1  ;;  %516 = vmatprep.mubr.msk.bf16.mxu0 %vm540_vm0, %v539_v0 }
 0x1c8   :  { %v255_v12 = vmax.f32 %v246_v9, 0.0  ;;  %v491_v13 = vpop.f32.mrb[11].mxu1 }
 0x1ca   :  { %v258_v14 = vpack.c.bf16 %v255_v12, %v255_v12 }
 0x1ce   :  { %517 = vmatmul.mubr.bf16.gmra.mrb[20].mxu0 %v258_v14 }
 0x291   :  { %v364_v16 = vpop.f32.mrb[12].mxu0 }
 0x292   :  { %v365_v17 = vadd.f32 %v415_v15, %v364_v16  ;;  %v510_v18 = vpop.f32.mrb[13].mxu0 }
 0x293   :  { %v367_v19 = vpop.f32.mrb[14].mxu0 }
 0x294   :  { %v386_v20 = vmax.f32 %v365_v17, 0.0  ;;  %v368_v21 = vadd.f32 %v415_v15, %v367_v19  ;;  %v511_v22 = vpop.f32.mrb[15].mxu0 }
 0x296   :  { %392 = vst.msk [vmem:[%s721_s7] sm:$0xff] %vm391_vm2, %v386_v20  ;;  %v387_v0 = vmax.f32 %v368_v21, 0.0 }
 0x298   :  { %393 = vst.msk [vmem:[%s721_s7 + $0x8] sm:$0xff] %vm391_vm2, %v387_v0 }
 0x299   :  { %v372_v23 = vpop.f32.mrb[16].mxu0 }
 0x29a   :  { %v373_v24 = vadd.f32 %v415_v15, %v372_v23  ;;  %v514_v25 = vpop.f32.mrb[17].mxu0 }
 0x29b   :  { %v375_v26 = vpop.f32.mrb[18].mxu0 }
 0x29c   :  { %v388_v27 = vmax.f32 %v373_v24, 0.0  ;;  %v376_v28 = vadd.f32 %v415_v15, %v375_v26  ;;  %v515_v29 = vpop.f32.mrb[19].mxu0 }
 0x29e   :  { %394 = vst.msk [vmem:[%s721_s7 + $0x10] sm:$0xff] %vm391_vm2, %v388_v27  ;;  %v389_v30 = vmax.f32 %v376_v28, 0.0 }
 0x2a0   :  { %395 = vst.msk [vmem:[%s721_s7 + $0x18] sm:$0xff] %vm391_vm2, %v389_v30 }
 0x2a1   :  { %v380_v31 = vpop.f32.mrb[20].mxu0 }
 0x2a2   :  { %v381_v32 = vadd.f32 %v415_v15, %v380_v31  ;;  %v518_v33 = vpop.f32.mrb[21].mxu0 }
 0x2a3   :  { %v383_v34 = vpop.f32.mrb[22].mxu0 }
 0x2a4   :  { %v390_v35 = vmax.f32 %v381_v32, 0.0  ;;  %v519_v36 = vpop.f32.mrb[23].mxu0 }
 0x2a6   :  { %396 = vst.msk [vmem:[%s721_s7 + $0x20] sm:$0xff] %vm391_vm2, %v390_v35 }

</bundles_post_ra>
